<compile_context>
chip_gen: v7x
topology: tpu7x:2x2x1
jax: 0.10.0
libtpu: 0.0.40
codegen_flags: <defaults>
</compile_context>

<pallas_src>
import functools

import jax
import jax.numpy as jnp
import numpy as np
from jax import lax
from jax.experimental import pallas as pl
from jax.experimental.pallas import tpu as pltpu


def _invdepth_kernel(x_ref, w_ref, b_ref, o_ref, pad_ref, *,
                     inv_min_depth, approx_sigmoid):
    """One (batch, H-strip) grid step.

    x_ref:   (1, C, H, W)    unpadded input image (VMEM, W in lanes)
    w_ref:   (Co*C*3*3,)     conv weights, flattened OIHW order (SMEM scalars)
    b_ref:   (Co,)           bias (SMEM scalars)
    o_ref:   (1, Co, TH, W)  output strip (VMEM, written directly in NCHW)
    pad_ref: (C, H+2, W+2)   VMEM scratch holding the zero-padded image
    """
    _, C, H, W = x_ref.shape
    _, Co, TH, _ = o_ref.shape

    s = pl.program_id(1)                               # H-strip index
    row0 = pl.multiple_of(s * TH, TH)                  # first output row of strip

    # Build the 1-pixel zero halo in VMEM (replaces the wrapper-side jnp.pad
    # HBM pass).  Zero + interior copy are VMEM-local vector stores; at
    # production strip sizes you would zero only the 1-pixel border instead.
    pad_ref[...] = jnp.zeros_like(pad_ref)
    pad_ref[:, pl.ds(1, H), pl.ds(1, W)] = x_ref[0].astype(jnp.float32)

    scale = jnp.float32(inv_min_depth)

    for co in range(Co):
        # One partial accumulator per kernel row -> 3 independent FMA chains
        # (restores ILP vs. a single 36-deep chain).
        partials = []
        for kh in range(3):
            acc = None
            for c in range(C):
                for kw in range(3):
                    wv = w_ref[((co * C + c) * 3 + kh) * 3 + kw].astype(jnp.float32)
                    # Shifted tap read straight from the padded scratch ref:
                    # an offset vector load, not a slice of a live vreg value.
                    slab = pad_ref[c, pl.ds(row0 + kh, TH), pl.ds(kw, W)]
                    term = wv * slab
                    acc = term if acc is None else acc + term
            partials.append(acc)
        conv = (partials[0] + partials[1]) + (partials[2] + b_ref[co].astype(jnp.float32))

        # sigmoid(conv) / min_depth with exp + reciprocal on the EUP slot and
        # the divide folded into a compile-time multiply.
        y = scale * pl.reciprocal(1.0 + jnp.exp(-conv), approx=approx_sigmoid)
        o_ref[0, co] = y.astype(o_ref.dtype)


def invdepth_forward(x_nchw, weight_oihw, bias, *, min_depth=0.5,
                     h_strips=1, approx_sigmoid=False):
    """InvDepth forward.

    x_nchw: (N, C, H, W), weight_oihw: (Co, C, 3, 3), bias: (Co,).
    h_strips: number of H strips (use >1 on v7x so both TensorCores work even
    at N=1; keep 1 on single-TC v5e/v6e for tiny images).
    """
    N, C, H, W = x_nchw.shape
    Co = weight_oihw.shape[0]
    assert H % h_strips == 0, "H must divide evenly into h_strips"
    TH = H // h_strips
    assert TH == H or TH % 8 == 0, "strip height must be full H or a multiple of 8"

    w_flat = weight_oihw.reshape(-1).astype(jnp.float32)   # (Co*C*9,) SMEM scalars
    b = bias.reshape(Co).astype(jnp.float32)                # (Co,)     SMEM scalars

    kernel = functools.partial(_invdepth_kernel,
                               inv_min_depth=1.0 / float(min_depth),
                               approx_sigmoid=approx_sigmoid)

    return pl.pallas_call(
        kernel,
        out_shape=jax.ShapeDtypeStruct((N, Co, H, W), x_nchw.dtype),
        grid=(N, h_strips),
        in_specs=[
            # Whole (unpadded) image; block index is constant across the strip
            # axis so Pallas does not re-DMA it per strip.
            pl.BlockSpec((1, C, H, W), lambda n, s: (n, 0, 0, 0)),
            pl.BlockSpec(memory_space=pltpu.MemorySpace.SMEM),   # weights
            pl.BlockSpec(memory_space=pltpu.MemorySpace.SMEM),   # bias
        ],
        out_specs=pl.BlockSpec((1, Co, TH, W), lambda n, s: (n, 0, s, 0)),
        scratch_shapes=[pltpu.VMEM((C, H + 2, W + 2), jnp.float32)],
        compiler_params=pltpu.CompilerParams(
            dimension_semantics=("parallel", "parallel")),
    )(x_nchw, w_flat, b)


def _reference_invdepth(x_nchw, weight_oihw, bias, *, min_depth=0.5):
    """Pure-JAX reference (lax conv) for correctness check."""
    y = lax.conv_general_dilated(
        x_nchw, weight_oihw, window_strides=(1, 1), padding=((1, 1), (1, 1)),
        dimension_numbers=("NCHW", "OIHW", "NCHW"))
    y = y + bias.reshape(1, -1, 1, 1)
    return jax.nn.sigmoid(y) / min_depth


if __name__ == "__main__":
    # Small shapes consistent with the module's forward: NCHW input.
    N, C_in, H, W = 2, 4, 16, 16
    C_out = 1
    MIN_DEPTH = 0.5

    key = jax.random.PRNGKey(0)
    kx, kw, kb = jax.random.split(key, 3)

    x = jax.random.normal(kx, (N, C_in, H, W), dtype=jnp.float32)

    # Deterministic params mimicking nn.Conv2d's default uniform(-1/sqrt(fan_in), +).
    fan_in = C_in * 3 * 3
    bound = 1.0 / np.sqrt(fan_in)
    weight = jax.random.uniform(kw, (C_out, C_in, 3, 3), jnp.float32, -bound, bound)
    bias = jax.random.uniform(kb, (C_out,), jnp.float32, -bound, bound)

    ref = jax.block_until_ready(
        _reference_invdepth(x, weight, bias, min_depth=MIN_DEPTH))

    # Single-strip path (what single-TC v5e/v6e would run for tiny images)...
    out1 = jax.block_until_ready(
        invdepth_forward(x, weight, bias, min_depth=MIN_DEPTH, h_strips=1))
    # ...and the 2-strip path that keeps both v7x TensorCores busy (also
    # exercises the in-kernel halo / dynamic strip indexing).
    out2 = jax.block_until_ready(
        invdepth_forward(x, weight, bias, min_depth=MIN_DEPTH, h_strips=2))

    for out in (out1, out2):
        assert out.shape == (N, C_out, H, W), out.shape
        np.testing.assert_allclose(np.asarray(out), np.asarray(ref),
                                   rtol=1e-5, atol=1e-5)

    print("KERNEL_OK")
</pallas_src>

<mosaic_0001>
module attributes {stable_mosaic.version = 11 : i64} {
  func.func @_invdepth_kernel(%arg0: i32, %arg1: i32, %arg2: memref<1x4x16x16xf32, #tpu.memory_space<vmem>>, %arg3: memref<36xf32, #tpu.memory_space<smem>>, %arg4: memref<1xf32, #tpu.memory_space<smem>>, %arg5: memref<1x1x16x16xf32, #tpu.memory_space<vmem>>, %arg6: memref<4x18x18xf32, #tpu.memory_space<vmem>>) attributes {dimension_semantics = [#tpu.dimension_semantics<parallel>, #tpu.dimension_semantics<parallel>], iteration_bounds = array<i64: 2, 1>, scalar_prefetch = 0 : i64, scratch_operands = 1 : i64, tpu.core_type = #tpu.core_type<tc>, window_params = [{transform_indices = @transform_0, window_bounds = array<i64: 1, 4, 16, 16>}, {transform_indices = @transform_1, window_bounds = array<i64: 36>}, {transform_indices = @transform_2, window_bounds = array<i64: 1>}, {transform_indices = @transform_3, window_bounds = array<i64: 1, 1, 16, 16>}]} {
    %c16_i32 = arith.constant 16 : i32
    %0 = arith.muli %arg1, %c16_i32 : i32
    %1 = tpu.assume_multiple %0, 16 : i32
    %cst = arith.constant 0.000000e+00 : f32
    %2 = vector.broadcast %cst : f32 to vector<4x18x18xf32>
    %c0 = arith.constant 0 : index
    %c0_0 = arith.constant 0 : index
    %c0_1 = arith.constant 0 : index
    %3 = vector.load %arg6[%c0, %c0_0, %c0_1] : memref<4x18x18xf32, #tpu.memory_space<vmem>>, vector<4x18x18xf32>
    tpu.vector_store %arg6[%c0, %c0_0, %c0_1], %2 {strides = array<i32>} : memref<4x18x18xf32, #tpu.memory_space<vmem>>, vector<4x18x18xf32>,
    %c0_2 = arith.constant 0 : index
    %c0_3 = arith.constant 0 : index
    %c0_4 = arith.constant 0 : index
    %c0_5 = arith.constant 0 : index
    %4 = vector.load %arg2[%c0_2, %c0_3, %c0_4, %c0_5] : memref<1x4x16x16xf32, #tpu.memory_space<vmem>>, vector<1x4x16x16xf32>
    %5 = vector.shape_cast %4 : vector<1x4x16x16xf32> to vector<4x16x16xf32>
    %c0_6 = arith.constant 0 : index
    %c1 = arith.constant 1 : index
    %c1_7 = arith.constant 1 : index
    %6 = vector.load %arg6[%c0_6, %c1, %c1_7] : memref<4x18x18xf32, #tpu.memory_space<vmem>>, vector<4x16x16xf32>
    tpu.vector_store %arg6[%c0_6, %c1, %c1_7], %5 {strides = array<i32>} : memref<4x18x18xf32, #tpu.memory_space<vmem>>, vector<4x16x16xf32>,
    %c0_8 = arith.constant 0 : index
    %7 = memref.load %arg3[%c0_8] : memref<36xf32, #tpu.memory_space<smem>>
    %c0_i32 = arith.constant 0 : i32
    %8 = arith.addi %1, %c0_i32 : i32
    %c0_9 = arith.constant 0 : index
    %9 = arith.index_cast %8 : i32 to index
    %c0_10 = arith.constant 0 : index
    %10 = vector.load %arg6[%c0_9, %9, %c0_10] : memref<4x18x18xf32, #tpu.memory_space<vmem>>, vector<1x16x16xf32>
    %11 = vector.shape_cast %10 : vector<1x16x16xf32> to vector<16x16xf32>
    %12 = vector.broadcast %7 : f32 to vector<16x16xf32>
    %13 = arith.mulf %12, %11 : vector<16x16xf32>
    %c1_11 = arith.constant 1 : index
    %14 = memref.load %arg3[%c1_11] : memref<36xf32, #tpu.memory_space<smem>>
    %c0_i32_12 = arith.constant 0 : i32
    %15 = arith.addi %1, %c0_i32_12 : i32
    %c0_13 = arith.constant 0 : index
    %16 = arith.index_cast %15 : i32 to index
    %c1_14 = arith.constant 1 : index
    %17 = vector.load %arg6[%c0_13, %16, %c1_14] : memref<4x18x18xf32, #tpu.memory_space<vmem>>, vector<1x16x16xf32>
    %18 = vector.shape_cast %17 : vector<1x16x16xf32> to vector<16x16xf32>
    %19 = vector.broadcast %14 : f32 to vector<16x16xf32>
    %20 = arith.mulf %19, %18 : vector<16x16xf32>
    %21 = arith.addf %13, %20 : vector<16x16xf32>
    %c2 = arith.constant 2 : index
    %22 = memref.load %arg3[%c2] : memref<36xf32, #tpu.memory_space<smem>>
    %c0_i32_15 = arith.constant 0 : i32
    %23 = arith.addi %1, %c0_i32_15 : i32
    %c0_16 = arith.constant 0 : index
    %24 = arith.index_cast %23 : i32 to index
    %c2_17 = arith.constant 2 : index
    %25 = vector.load %arg6[%c0_16, %24, %c2_17] : memref<4x18x18xf32, #tpu.memory_space<vmem>>, vector<1x16x16xf32>
    %26 = vector.shape_cast %25 : vector<1x16x16xf32> to vector<16x16xf32>
    %27 = vector.broadcast %22 : f32 to vector<16x16xf32>
    %28 = arith.mulf %27, %26 : vector<16x16xf32>
    %29 = arith.addf %21, %28 : vector<16x16xf32>
    %c9 = arith.constant 9 : index
    %30 = memref.load %arg3[%c9] : memref<36xf32, #tpu.memory_space<smem>>
    %c0_i32_18 = arith.constant 0 : i32
    %31 = arith.addi %1, %c0_i32_18 : i32
    %c1_19 = arith.constant 1 : index
    %32 = arith.index_cast %31 : i32 to index
    %c0_20 = arith.constant 0 : index
    %33 = vector.load %arg6[%c1_19, %32, %c0_20] : memref<4x18x18xf32, #tpu.memory_space<vmem>>, vector<1x16x16xf32>
    %34 = vector.shape_cast %33 : vector<1x16x16xf32> to vector<16x16xf32>
    %35 = vector.broadcast %30 : f32 to vector<16x16xf32>
    %36 = arith.mulf %35, %34 : vector<16x16xf32>
    %37 = arith.addf %29, %36 : vector<16x16xf32>
    %c10 = arith.constant 10 : index
    %38 = memref.load %arg3[%c10] : memref<36xf32, #tpu.memory_space<smem>>
    %c0_i32_21 = arith.constant 0 : i32
    %39 = arith.addi %1, %c0_i32_21 : i32
    %c1_22 = arith.constant 1 : index
    %40 = arith.index_cast %39 : i32 to index
    %c1_23 = arith.constant 1 : index
    %41 = vector.load %arg6[%c1_22, %40, %c1_23] : memref<4x18x18xf32, #tpu.memory_space<vmem>>, vector<1x16x16xf32>
    %42 = vector.shape_cast %41 : vector<1x16x16xf32> to vector<16x16xf32>
    %43 = vector.broadcast %38 : f32 to vector<16x16xf32>
    %44 = arith.mulf %43, %42 : vector<16x16xf32>
    %45 = arith.addf %37, %44 : vector<16x16xf32>
    %c11 = arith.constant 11 : index
    %46 = memref.load %arg3[%c11] : memref<36xf32, #tpu.memory_space<smem>>
    %c0_i32_24 = arith.constant 0 : i32
    %47 = arith.addi %1, %c0_i32_24 : i32
    %c1_25 = arith.constant 1 : index
    %48 = arith.index_cast %47 : i32 to index
    %c2_26 = arith.constant 2 : index
    %49 = vector.load %arg6[%c1_25, %48, %c2_26] : memref<4x18x18xf32, #tpu.memory_space<vmem>>, vector<1x16x16xf32>
    %50 = vector.shape_cast %49 : vector<1x16x16xf32> to vector<16x16xf32>
    %51 = vector.broadcast %46 : f32 to vector<16x16xf32>
    %52 = arith.mulf %51, %50 : vector<16x16xf32>
    %53 = arith.addf %45, %52 : vector<16x16xf32>
    %c18 = arith.constant 18 : index
    %54 = memref.load %arg3[%c18] : memref<36xf32, #tpu.memory_space<smem>>
    %c0_i32_27 = arith.constant 0 : i32
    %55 = arith.addi %1, %c0_i32_27 : i32
    %c2_28 = arith.constant 2 : index
    %56 = arith.index_cast %55 : i32 to index
    %c0_29 = arith.constant 0 : index
    %57 = vector.load %arg6[%c2_28, %56, %c0_29] : memref<4x18x18xf32, #tpu.memory_space<vmem>>, vector<1x16x16xf32>
    %58 = vector.shape_cast %57 : vector<1x16x16xf32> to vector<16x16xf32>
    %59 = vector.broadcast %54 : f32 to vector<16x16xf32>
    %60 = arith.mulf %59, %58 : vector<16x16xf32>
    %61 = arith.addf %53, %60 : vector<16x16xf32>
    %c19 = arith.constant 19 : index
    %62 = memref.load %arg3[%c19] : memref<36xf32, #tpu.memory_space<smem>>
    %c0_i32_30 = arith.constant 0 : i32
    %63 = arith.addi %1, %c0_i32_30 : i32
    %c2_31 = arith.constant 2 : index
    %64 = arith.index_cast %63 : i32 to index
    %c1_32 = arith.constant 1 : index
    %65 = vector.load %arg6[%c2_31, %64, %c1_32] : memref<4x18x18xf32, #tpu.memory_space<vmem>>, vector<1x16x16xf32>
    %66 = vector.shape_cast %65 : vector<1x16x16xf32> to vector<16x16xf32>
    %67 = vector.broadcast %62 : f32 to vector<16x16xf32>
    %68 = arith.mulf %67, %66 : vector<16x16xf32>
    %69 = arith.addf %61, %68 : vector<16x16xf32>
    %c20 = arith.constant 20 : index
    %70 = memref.load %arg3[%c20] : memref<36xf32, #tpu.memory_space<smem>>
    %c0_i32_33 = arith.constant 0 : i32
    %71 = arith.addi %1, %c0_i32_33 : i32
    %c2_34 = arith.constant 2 : index
    %72 = arith.index_cast %71 : i32 to index
    %c2_35 = arith.constant 2 : index
    %73 = vector.load %arg6[%c2_34, %72, %c2_35] : memref<4x18x18xf32, #tpu.memory_space<vmem>>, vector<1x16x16xf32>
    %74 = vector.shape_cast %73 : vector<1x16x16xf32> to vector<16x16xf32>
    %75 = vector.broadcast %70 : f32 to vector<16x16xf32>
    %76 = arith.mulf %75, %74 : vector<16x16xf32>
    %77 = arith.addf %69, %76 : vector<16x16xf32>
    %c27 = arith.constant 27 : index
    %78 = memref.load %arg3[%c27] : memref<36xf32, #tpu.memory_space<smem>>
    %c0_i32_36 = arith.constant 0 : i32
    %79 = arith.addi %1, %c0_i32_36 : i32
    %c3 = arith.constant 3 : index
    %80 = arith.index_cast %79 : i32 to index
    %c0_37 = arith.constant 0 : index
    %81 = vector.load %arg6[%c3, %80, %c0_37] : memref<4x18x18xf32, #tpu.memory_space<vmem>>, vector<1x16x16xf32>
    %82 = vector.shape_cast %81 : vector<1x16x16xf32> to vector<16x16xf32>
    %83 = vector.broadcast %78 : f32 to vector<16x16xf32>
    %84 = arith.mulf %83, %82 : vector<16x16xf32>
    %85 = arith.addf %77, %84 : vector<16x16xf32>
    %c28 = arith.constant 28 : index
    %86 = memref.load %arg3[%c28] : memref<36xf32, #tpu.memory_space<smem>>
    %c0_i32_38 = arith.constant 0 : i32
    %87 = arith.addi %1, %c0_i32_38 : i32
    %c3_39 = arith.constant 3 : index
    %88 = arith.index_cast %87 : i32 to index
    %c1_40 = arith.constant 1 : index
    %89 = vector.load %arg6[%c3_39, %88, %c1_40] : memref<4x18x18xf32, #tpu.memory_space<vmem>>, vector<1x16x16xf32>
    %90 = vector.shape_cast %89 : vector<1x16x16xf32> to vector<16x16xf32>
    %91 = vector.broadcast %86 : f32 to vector<16x16xf32>
    %92 = arith.mulf %91, %90 : vector<16x16xf32>
    %93 = arith.addf %85, %92 : vector<16x16xf32>
    %c29 = arith.constant 29 : index
    %94 = memref.load %arg3[%c29] : memref<36xf32, #tpu.memory_space<smem>>
    %c0_i32_41 = arith.constant 0 : i32
    %95 = arith.addi %1, %c0_i32_41 : i32
    %c3_42 = arith.constant 3 : index
    %96 = arith.index_cast %95 : i32 to index
    %c2_43 = arith.constant 2 : index
    %97 = vector.load %arg6[%c3_42, %96, %c2_43] : memref<4x18x18xf32, #tpu.memory_space<vmem>>, vector<1x16x16xf32>
    %98 = vector.shape_cast %97 : vector<1x16x16xf32> to vector<16x16xf32>
    %99 = vector.broadcast %94 : f32 to vector<16x16xf32>
    %100 = arith.mulf %99, %98 : vector<16x16xf32>
    %101 = arith.addf %93, %100 : vector<16x16xf32>
    %c3_44 = arith.constant 3 : index
    %102 = memref.load %arg3[%c3_44] : memref<36xf32, #tpu.memory_space<smem>>
    %c1_i32 = arith.constant 1 : i32
    %103 = arith.addi %1, %c1_i32 : i32
    %c0_45 = arith.constant 0 : index
    %104 = arith.index_cast %103 : i32 to index
    %c0_46 = arith.constant 0 : index
    %105 = vector.load %arg6[%c0_45, %104, %c0_46] : memref<4x18x18xf32, #tpu.memory_space<vmem>>, vector<1x16x16xf32>
    %106 = vector.shape_cast %105 : vector<1x16x16xf32> to vector<16x16xf32>
    %107 = vector.broadcast %102 : f32 to vector<16x16xf32>
    %108 = arith.mulf %107, %106 : vector<16x16xf32>
    %c4 = arith.constant 4 : index
    %109 = memref.load %arg3[%c4] : memref<36xf32, #tpu.memory_space<smem>>
    %c1_i32_47 = arith.constant 1 : i32
    %110 = arith.addi %1, %c1_i32_47 : i32
    %c0_48 = arith.constant 0 : index
    %111 = arith.index_cast %110 : i32 to index
    %c1_49 = arith.constant 1 : index
    %112 = vector.load %arg6[%c0_48, %111, %c1_49] : memref<4x18x18xf32, #tpu.memory_space<vmem>>, vector<1x16x16xf32>
    %113 = vector.shape_cast %112 : vector<1x16x16xf32> to vector<16x16xf32>
    %114 = vector.broadcast %109 : f32 to vector<16x16xf32>
    %115 = arith.mulf %114, %113 : vector<16x16xf32>
    %116 = arith.addf %108, %115 : vector<16x16xf32>
    %c5 = arith.constant 5 : index
    %117 = memref.load %arg3[%c5] : memref<36xf32, #tpu.memory_space<smem>>
    %c1_i32_50 = arith.constant 1 : i32
    %118 = arith.addi %1, %c1_i32_50 : i32
    %c0_51 = arith.constant 0 : index
    %119 = arith.index_cast %118 : i32 to index
    %c2_52 = arith.constant 2 : index
    %120 = vector.load %arg6[%c0_51, %119, %c2_52] : memref<4x18x18xf32, #tpu.memory_space<vmem>>, vector<1x16x16xf32>
    %121 = vector.shape_cast %120 : vector<1x16x16xf32> to vector<16x16xf32>
    %122 = vector.broadcast %117 : f32 to vector<16x16xf32>
    %123 = arith.mulf %122, %121 : vector<16x16xf32>
    %124 = arith.addf %116, %123 : vector<16x16xf32>
    %c12 = arith.constant 12 : index
    %125 = memref.load %arg3[%c12] : memref<36xf32, #tpu.memory_space<smem>>
    %c1_i32_53 = arith.constant 1 : i32
    %126 = arith.addi %1, %c1_i32_53 : i32
    %c1_54 = arith.constant 1 : index
    %127 = arith.index_cast %126 : i32 to index
    %c0_55 = arith.constant 0 : index
    %128 = vector.load %arg6[%c1_54, %127, %c0_55] : memref<4x18x18xf32, #tpu.memory_space<vmem>>, vector<1x16x16xf32>
    %129 = vector.shape_cast %128 : vector<1x16x16xf32> to vector<16x16xf32>
    %130 = vector.broadcast %125 : f32 to vector<16x16xf32>
    %131 = arith.mulf %130, %129 : vector<16x16xf32>
    %132 = arith.addf %124, %131 : vector<16x16xf32>
    %c13 = arith.constant 13 : index
    %133 = memref.load %arg3[%c13] : memref<36xf32, #tpu.memory_space<smem>>
    %c1_i32_56 = arith.constant 1 : i32
    %134 = arith.addi %1, %c1_i32_56 : i32
    %c1_57 = arith.constant 1 : index
    %135 = arith.index_cast %134 : i32 to index
    %c1_58 = arith.constant 1 : index
    %136 = vector.load %arg6[%c1_57, %135, %c1_58] : memref<4x18x18xf32, #tpu.memory_space<vmem>>, vector<1x16x16xf32>
    %137 = vector.shape_cast %136 : vector<1x16x16xf32> to vector<16x16xf32>
    %138 = vector.broadcast %133 : f32 to vector<16x16xf32>
    %139 = arith.mulf %138, %137 : vector<16x16xf32>
    %140 = arith.addf %132, %139 : vector<16x16xf32>
    %c14 = arith.constant 14 : index
    %141 = memref.load %arg3[%c14] : memref<36xf32, #tpu.memory_space<smem>>
    %c1_i32_59 = arith.constant 1 : i32
    %142 = arith.addi %1, %c1_i32_59 : i32
    %c1_60 = arith.constant 1 : index
    %143 = arith.index_cast %142 : i32 to index
    %c2_61 = arith.constant 2 : index
    %144 = vector.load %arg6[%c1_60, %143, %c2_61] : memref<4x18x18xf32, #tpu.memory_space<vmem>>, vector<1x16x16xf32>
    %145 = vector.shape_cast %144 : vector<1x16x16xf32> to vector<16x16xf32>
    %146 = vector.broadcast %141 : f32 to vector<16x16xf32>
    %147 = arith.mulf %146, %145 : vector<16x16xf32>
    %148 = arith.addf %140, %147 : vector<16x16xf32>
    %c21 = arith.constant 21 : index
    %149 = memref.load %arg3[%c21] : memref<36xf32, #tpu.memory_space<smem>>
    %c1_i32_62 = arith.constant 1 : i32
    %150 = arith.addi %1, %c1_i32_62 : i32
    %c2_63 = arith.constant 2 : index
    %151 = arith.index_cast %150 : i32 to index
    %c0_64 = arith.constant 0 : index
    %152 = vector.load %arg6[%c2_63, %151, %c0_64] : memref<4x18x18xf32, #tpu.memory_space<vmem>>, vector<1x16x16xf32>
    %153 = vector.shape_cast %152 : vector<1x16x16xf32> to vector<16x16xf32>
    %154 = vector.broadcast %149 : f32 to vector<16x16xf32>
    %155 = arith.mulf %154, %153 : vector<16x16xf32>
    %156 = arith.addf %148, %155 : vector<16x16xf32>
    %c22 = arith.constant 22 : index
    %157 = memref.load %arg3[%c22] : memref<36xf32, #tpu.memory_space<smem>>
    %c1_i32_65 = arith.constant 1 : i32
    %158 = arith.addi %1, %c1_i32_65 : i32
    %c2_66 = arith.constant 2 : index
    %159 = arith.index_cast %158 : i32 to index
    %c1_67 = arith.constant 1 : index
    %160 = vector.load %arg6[%c2_66, %159, %c1_67] : memref<4x18x18xf32, #tpu.memory_space<vmem>>, vector<1x16x16xf32>
    %161 = vector.shape_cast %160 : vector<1x16x16xf32> to vector<16x16xf32>
    %162 = vector.broadcast %157 : f32 to vector<16x16xf32>
    %163 = arith.mulf %162, %161 : vector<16x16xf32>
    %164 = arith.addf %156, %163 : vector<16x16xf32>
    %c23 = arith.constant 23 : index
    %165 = memref.load %arg3[%c23] : memref<36xf32, #tpu.memory_space<smem>>
    %c1_i32_68 = arith.constant 1 : i32
    %166 = arith.addi %1, %c1_i32_68 : i32
    %c2_69 = arith.constant 2 : index
    %167 = arith.index_cast %166 : i32 to index
    %c2_70 = arith.constant 2 : index
    %168 = vector.load %arg6[%c2_69, %167, %c2_70] : memref<4x18x18xf32, #tpu.memory_space<vmem>>, vector<1x16x16xf32>
    %169 = vector.shape_cast %168 : vector<1x16x16xf32> to vector<16x16xf32>
    %170 = vector.broadcast %165 : f32 to vector<16x16xf32>
    %171 = arith.mulf %170, %169 : vector<16x16xf32>
    %172 = arith.addf %164, %171 : vector<16x16xf32>
    %c30 = arith.constant 30 : index
    %173 = memref.load %arg3[%c30] : memref<36xf32, #tpu.memory_space<smem>>
    %c1_i32_71 = arith.constant 1 : i32
    %174 = arith.addi %1, %c1_i32_71 : i32
    %c3_72 = arith.constant 3 : index
    %175 = arith.index_cast %174 : i32 to index
    %c0_73 = arith.constant 0 : index
    %176 = vector.load %arg6[%c3_72, %175, %c0_73] : memref<4x18x18xf32, #tpu.memory_space<vmem>>, vector<1x16x16xf32>
    %177 = vector.shape_cast %176 : vector<1x16x16xf32> to vector<16x16xf32>
    %178 = vector.broadcast %173 : f32 to vector<16x16xf32>
    %179 = arith.mulf %178, %177 : vector<16x16xf32>
    %180 = arith.addf %172, %179 : vector<16x16xf32>
    %c31 = arith.constant 31 : index
    %181 = memref.load %arg3[%c31] : memref<36xf32, #tpu.memory_space<smem>>
    %c1_i32_74 = arith.constant 1 : i32
    %182 = arith.addi %1, %c1_i32_74 : i32
    %c3_75 = arith.constant 3 : index
    %183 = arith.index_cast %182 : i32 to index
    %c1_76 = arith.constant 1 : index
    %184 = vector.load %arg6[%c3_75, %183, %c1_76] : memref<4x18x18xf32, #tpu.memory_space<vmem>>, vector<1x16x16xf32>
    %185 = vector.shape_cast %184 : vector<1x16x16xf32> to vector<16x16xf32>
    %186 = vector.broadcast %181 : f32 to vector<16x16xf32>
    %187 = arith.mulf %186, %185 : vector<16x16xf32>
    %188 = arith.addf %180, %187 : vector<16x16xf32>
    %c32 = arith.constant 32 : index
    %189 = memref.load %arg3[%c32] : memref<36xf32, #tpu.memory_space<smem>>
    %c1_i32_77 = arith.constant 1 : i32
    %190 = arith.addi %1, %c1_i32_77 : i32
    %c3_78 = arith.constant 3 : index
    %191 = arith.index_cast %190 : i32 to index
    %c2_79 = arith.constant 2 : index
    %192 = vector.load %arg6[%c3_78, %191, %c2_79] : memref<4x18x18xf32, #tpu.memory_space<vmem>>, vector<1x16x16xf32>
    %193 = vector.shape_cast %192 : vector<1x16x16xf32> to vector<16x16xf32>
    %194 = vector.broadcast %189 : f32 to vector<16x16xf32>
    %195 = arith.mulf %194, %193 : vector<16x16xf32>
    %196 = arith.addf %188, %195 : vector<16x16xf32>
    %c6 = arith.constant 6 : index
    %197 = memref.load %arg3[%c6] : memref<36xf32, #tpu.memory_space<smem>>
    %c2_i32 = arith.constant 2 : i32
    %198 = arith.addi %1, %c2_i32 : i32
    %c0_80 = arith.constant 0 : index
    %199 = arith.index_cast %198 : i32 to index
    %c0_81 = arith.constant 0 : index
    %200 = vector.load %arg6[%c0_80, %199, %c0_81] : memref<4x18x18xf32, #tpu.memory_space<vmem>>, vector<1x16x16xf32>
    %201 = vector.shape_cast %200 : vector<1x16x16xf32> to vector<16x16xf32>
    %202 = vector.broadcast %197 : f32 to vector<16x16xf32>
    %203 = arith.mulf %202, %201 : vector<16x16xf32>
    %c7 = arith.constant 7 : index
    %204 = memref.load %arg3[%c7] : memref<36xf32, #tpu.memory_space<smem>>
    %c2_i32_82 = arith.constant 2 : i32
    %205 = arith.addi %1, %c2_i32_82 : i32
    %c0_83 = arith.constant 0 : index
    %206 = arith.index_cast %205 : i32 to index
    %c1_84 = arith.constant 1 : index
    %207 = vector.load %arg6[%c0_83, %206, %c1_84] : memref<4x18x18xf32, #tpu.memory_space<vmem>>, vector<1x16x16xf32>
    %208 = vector.shape_cast %207 : vector<1x16x16xf32> to vector<16x16xf32>
    %209 = vector.broadcast %204 : f32 to vector<16x16xf32>
    %210 = arith.mulf %209, %208 : vector<16x16xf32>
    %211 = arith.addf %203, %210 : vector<16x16xf32>
    %c8 = arith.constant 8 : index
    %212 = memref.load %arg3[%c8] : memref<36xf32, #tpu.memory_space<smem>>
    %c2_i32_85 = arith.constant 2 : i32
    %213 = arith.addi %1, %c2_i32_85 : i32
    %c0_86 = arith.constant 0 : index
    %214 = arith.index_cast %213 : i32 to index
    %c2_87 = arith.constant 2 : index
    %215 = vector.load %arg6[%c0_86, %214, %c2_87] : memref<4x18x18xf32, #tpu.memory_space<vmem>>, vector<1x16x16xf32>
    %216 = vector.shape_cast %215 : vector<1x16x16xf32> to vector<16x16xf32>
    %217 = vector.broadcast %212 : f32 to vector<16x16xf32>
    %218 = arith.mulf %217, %216 : vector<16x16xf32>
    %219 = arith.addf %211, %218 : vector<16x16xf32>
    %c15 = arith.constant 15 : index
    %220 = memref.load %arg3[%c15] : memref<36xf32, #tpu.memory_space<smem>>
    %c2_i32_88 = arith.constant 2 : i32
    %221 = arith.addi %1, %c2_i32_88 : i32
    %c1_89 = arith.constant 1 : index
    %222 = arith.index_cast %221 : i32 to index
    %c0_90 = arith.constant 0 : index
    %223 = vector.load %arg6[%c1_89, %222, %c0_90] : memref<4x18x18xf32, #tpu.memory_space<vmem>>, vector<1x16x16xf32>
    %224 = vector.shape_cast %223 : vector<1x16x16xf32> to vector<16x16xf32>
    %225 = vector.broadcast %220 : f32 to vector<16x16xf32>
    %226 = arith.mulf %225, %224 : vector<16x16xf32>
    %227 = arith.addf %219, %226 : vector<16x16xf32>
    %c16 = arith.constant 16 : index
    %228 = memref.load %arg3[%c16] : memref<36xf32, #tpu.memory_space<smem>>
    %c2_i32_91 = arith.constant 2 : i32
    %229 = arith.addi %1, %c2_i32_91 : i32
    %c1_92 = arith.constant 1 : index
    %230 = arith.index_cast %229 : i32 to index
    %c1_93 = arith.constant 1 : index
    %231 = vector.load %arg6[%c1_92, %230, %c1_93] : memref<4x18x18xf32, #tpu.memory_space<vmem>>, vector<1x16x16xf32>
    %232 = vector.shape_cast %231 : vector<1x16x16xf32> to vector<16x16xf32>
    %233 = vector.broadcast %228 : f32 to vector<16x16xf32>
    %234 = arith.mulf %233, %232 : vector<16x16xf32>
    %235 = arith.addf %227, %234 : vector<16x16xf32>
    %c17 = arith.constant 17 : index
    %236 = memref.load %arg3[%c17] : memref<36xf32, #tpu.memory_space<smem>>
    %c2_i32_94 = arith.constant 2 : i32
    %237 = arith.addi %1, %c2_i32_94 : i32
    %c1_95 = arith.constant 1 : index
    %238 = arith.index_cast %237 : i32 to index
    %c2_96 = arith.constant 2 : index
    %239 = vector.load %arg6[%c1_95, %238, %c2_96] : memref<4x18x18xf32, #tpu.memory_space<vmem>>, vector<1x16x16xf32>
    %240 = vector.shape_cast %239 : vector<1x16x16xf32> to vector<16x16xf32>
    %241 = vector.broadcast %236 : f32 to vector<16x16xf32>
    %242 = arith.mulf %241, %240 : vector<16x16xf32>
    %243 = arith.addf %235, %242 : vector<16x16xf32>
    %c24 = arith.constant 24 : index
    %244 = memref.load %arg3[%c24] : memref<36xf32, #tpu.memory_space<smem>>
    %c2_i32_97 = arith.constant 2 : i32
    %245 = arith.addi %1, %c2_i32_97 : i32
    %c2_98 = arith.constant 2 : index
    %246 = arith.index_cast %245 : i32 to index
    %c0_99 = arith.constant 0 : index
    %247 = vector.load %arg6[%c2_98, %246, %c0_99] : memref<4x18x18xf32, #tpu.memory_space<vmem>>, vector<1x16x16xf32>
    %248 = vector.shape_cast %247 : vector<1x16x16xf32> to vector<16x16xf32>
    %249 = vector.broadcast %244 : f32 to vector<16x16xf32>
    %250 = arith.mulf %249, %248 : vector<16x16xf32>
    %251 = arith.addf %243, %250 : vector<16x16xf32>
    %c25 = arith.constant 25 : index
    %252 = memref.load %arg3[%c25] : memref<36xf32, #tpu.memory_space<smem>>
    %c2_i32_100 = arith.constant 2 : i32
    %253 = arith.addi %1, %c2_i32_100 : i32
    %c2_101 = arith.constant 2 : index
    %254 = arith.index_cast %253 : i32 to index
    %c1_102 = arith.constant 1 : index
    %255 = vector.load %arg6[%c2_101, %254, %c1_102] : memref<4x18x18xf32, #tpu.memory_space<vmem>>, vector<1x16x16xf32>
    %256 = vector.shape_cast %255 : vector<1x16x16xf32> to vector<16x16xf32>
    %257 = vector.broadcast %252 : f32 to vector<16x16xf32>
    %258 = arith.mulf %257, %256 : vector<16x16xf32>
    %259 = arith.addf %251, %258 : vector<16x16xf32>
    %c26 = arith.constant 26 : index
    %260 = memref.load %arg3[%c26] : memref<36xf32, #tpu.memory_space<smem>>
    %c2_i32_103 = arith.constant 2 : i32
    %261 = arith.addi %1, %c2_i32_103 : i32
    %c2_104 = arith.constant 2 : index
    %262 = arith.index_cast %261 : i32 to index
    %c2_105 = arith.constant 2 : index
    %263 = vector.load %arg6[%c2_104, %262, %c2_105] : memref<4x18x18xf32, #tpu.memory_space<vmem>>, vector<1x16x16xf32>
    %264 = vector.shape_cast %263 : vector<1x16x16xf32> to vector<16x16xf32>
    %265 = vector.broadcast %260 : f32 to vector<16x16xf32>
    %266 = arith.mulf %265, %264 : vector<16x16xf32>
    %267 = arith.addf %259, %266 : vector<16x16xf32>
    %c33 = arith.constant 33 : index
    %268 = memref.load %arg3[%c33] : memref<36xf32, #tpu.memory_space<smem>>
    %c2_i32_106 = arith.constant 2 : i32
    %269 = arith.addi %1, %c2_i32_106 : i32
    %c3_107 = arith.constant 3 : index
    %270 = arith.index_cast %269 : i32 to index
    %c0_108 = arith.constant 0 : index
    %271 = vector.load %arg6[%c3_107, %270, %c0_108] : memref<4x18x18xf32, #tpu.memory_space<vmem>>, vector<1x16x16xf32>
    %272 = vector.shape_cast %271 : vector<1x16x16xf32> to vector<16x16xf32>
    %273 = vector.broadcast %268 : f32 to vector<16x16xf32>
    %274 = arith.mulf %273, %272 : vector<16x16xf32>
    %275 = arith.addf %267, %274 : vector<16x16xf32>
    %c34 = arith.constant 34 : index
    %276 = memref.load %arg3[%c34] : memref<36xf32, #tpu.memory_space<smem>>
    %c2_i32_109 = arith.constant 2 : i32
    %277 = arith.addi %1, %c2_i32_109 : i32
    %c3_110 = arith.constant 3 : index
    %278 = arith.index_cast %277 : i32 to index
    %c1_111 = arith.constant 1 : index
    %279 = vector.load %arg6[%c3_110, %278, %c1_111] : memref<4x18x18xf32, #tpu.memory_space<vmem>>, vector<1x16x16xf32>
    %280 = vector.shape_cast %279 : vector<1x16x16xf32> to vector<16x16xf32>
    %281 = vector.broadcast %276 : f32 to vector<16x16xf32>
    %282 = arith.mulf %281, %280 : vector<16x16xf32>
    %283 = arith.addf %275, %282 : vector<16x16xf32>
    %c35 = arith.constant 35 : index
    %284 = memref.load %arg3[%c35] : memref<36xf32, #tpu.memory_space<smem>>
    %c2_i32_112 = arith.constant 2 : i32
    %285 = arith.addi %1, %c2_i32_112 : i32
    %c3_113 = arith.constant 3 : index
    %286 = arith.index_cast %285 : i32 to index
    %c2_114 = arith.constant 2 : index
    %287 = vector.load %arg6[%c3_113, %286, %c2_114] : memref<4x18x18xf32, #tpu.memory_space<vmem>>, vector<1x16x16xf32>
    %288 = vector.shape_cast %287 : vector<1x16x16xf32> to vector<16x16xf32>
    %289 = vector.broadcast %284 : f32 to vector<16x16xf32>
    %290 = arith.mulf %289, %288 : vector<16x16xf32>
    %291 = arith.addf %283, %290 : vector<16x16xf32>
    %292 = arith.addf %101, %196 : vector<16x16xf32>
    %c0_115 = arith.constant 0 : index
    %293 = memref.load %arg4[%c0_115] : memref<1xf32, #tpu.memory_space<smem>>
    %294 = vector.broadcast %293 : f32 to vector<16x16xf32>
    %295 = arith.addf %291, %294 : vector<16x16xf32>
    %296 = arith.addf %292, %295 : vector<16x16xf32>
    %cst_116 = arith.constant 0.000000e+00 : f32
    %297 = vector.broadcast %cst_116 : f32 to vector<16x16xf32>
    %298 = arith.subf %297, %296 : vector<16x16xf32>
    %299 = math.exp %298 : vector<16x16xf32>
    %cst_117 = arith.constant 1.000000e+00 : f32
    %300 = vector.broadcast %cst_117 : f32 to vector<16x16xf32>
    %301 = arith.addf %300, %299 : vector<16x16xf32>
    %302 = tpu.reciprocal %301 : vector<16x16xf32> -> vector<16x16xf32>
    %cst_118 = arith.constant 2.000000e+00 : f32
    %303 = vector.broadcast %cst_118 : f32 to vector<16x16xf32>
    %304 = arith.mulf %303, %302 : vector<16x16xf32>
    %c0_119 = arith.constant 0 : index
    %c0_120 = arith.constant 0 : index
    %c0_121 = arith.constant 0 : index
    %c0_122 = arith.constant 0 : index
    %305 = vector.load %arg5[%c0_119, %c0_120, %c0_121, %c0_122] : memref<1x1x16x16xf32, #tpu.memory_space<vmem>>, vector<1x1x16x16xf32>
    %306 = vector.shape_cast %305 : vector<1x1x16x16xf32> to vector<16x16xf32>
    %307 = vector.shape_cast %304 : vector<16x16xf32> to vector<1x1x16x16xf32>
    tpu.vector_store %arg5[%c0_119, %c0_120, %c0_121, %c0_122], %307 {strides = array<i32>} : memref<1x1x16x16xf32, #tpu.memory_space<vmem>>, vector<1x1x16x16xf32>,
    return
  }
  func.func @transform_0(%arg0: i32, %arg1: i32) -> (i32, i32, i32, i32) {
    %c0_i32 = arith.constant 0 : i32
    %c0_i32_0 = arith.constant 0 : i32
    %c0_i32_1 = arith.constant 0 : i32
    %c0_i32_2 = arith.constant 0 : i32
    return %arg0, %c0_i32, %c0_i32_0, %c0_i32_1 : i32, i32, i32, i32
  }
  func.func @transform_1(%arg0: i32, %arg1: i32) -> i32 {
    %c0_i32 = arith.constant 0 : i32
    %c0_i32_0 = arith.constant 0 : i32
    return %c0_i32 : i32
  }
  func.func @transform_2(%arg0: i32, %arg1: i32) -> i32 {
    %c0_i32 = arith.constant 0 : i32
    %c0_i32_0 = arith.constant 0 : i32
    return %c0_i32 : i32
  }
  func.func @transform_3(%arg0: i32, %arg1: i32) -> (i32, i32, i32, i32) {
    %c0_i32 = arith.constant 0 : i32
    %c0_i32_0 = arith.constant 0 : i32
    %c0_i32_1 = arith.constant 0 : i32
    return %arg0, %c0_i32, %arg1, %c0_i32_0 : i32, i32, i32, i32
  }
}

</mosaic_0001>

<bundles_post_ra>
// kernel: tpu_custom_call.1
= control target key start
LH: loop header
LB: loop body
LE: loop exit
PB: predicated region body
PF: predicated region fallthrough
CT: control target
= control target key end

     0   :  { %s1648_s0 = inlined_call_operand.hbm [shape: f32[2,4,16,16], index: 0, kind: input, shape index: {}]   ;;  %s1649_s1 = inlined_call_operand.vmem [shape: f32[36], index: 1, kind: input, shape index: {}]   ;;  %s1650_s2 = inlined_call_operand.<no memory space> [shape: f32[1], index: 2, kind: input, shape index: {}]   ;;  %s1651_s3 = inlined_call_operand.hbm [shape: f32[2,1,16,16], index: 3, kind: output, shape index: {}]  }
   0x1   :  { %8 = sst [smem:[#allocation3]] %s1650_s2 }
   0x2   :  { %9 = vsyncpa [#allocation5], 0 }
   0x3   :  { %11 = vsyncpa [#allocation5 + $0x1], 0 }
   0x4   :  { %12 = vsyncpa [#allocation7], 0 }
   0x5   :  { %13 = vsyncpa [#allocation6], 0 }
   0x6   :  { %15 = vsyncpa [#allocation6 + $0x1], 0  ;;  %s1234_s14 = smov 0   ;;  %s1236_s15 = smov 0  }
   0x7   :  { %s1238_s16 = smov 0   ;;  %s1240_s17 = smov 0  }
   0x8   :  { %s1242_s18 = smov 0   ;;  %s1244_s19 = smov 0  }
   0x9 LB: > { %s902_s2 = sadd.s32 4294967295, %s1198_s19   ;;  %s903_s20 = sadd.s32 4294967294, %s1198_s19   ;;  %s1198_s19 = sphi %s1244_s19, %s21_s19   ;;  %s1194_s18 = sphi %s1242_s18, %s1674_s18   ;;  %s1190_s17 = sphi %s1240_s17, %s1673_s17   ;;  %s1186_s16 = sphi %s1238_s16, %s1672_s16   ;;  %s1182_s15 = sphi %s1236_s15, %s1671_s15   ;;  %s1178_s14 = sphi %s1234_s14, %s1670_s14  }
   0xa   : > { %s40_s21 = sadd.s32 1, %s1186_s16  ;;  %p47_p0 = scmp.ne.s32.totalorder %s1186_s16, %s1182_s15 }
   0xb   : > { %p48_p1 = scmp.eq.s32.totalorder %s1198_s19, 0  ;;  %p53_p2 = scmp.ne.s32.totalorder %s1182_s15, %s1178_s14 }
   0xc   : > { %p1272_p3 = scmp.eq.s32.totalorder %s902_s2, 0  ;;  %p121_p4 = scmp.eq.s32.totalorder %s902_s2, 1 }
   0xd   : > { %p1276_p5 = por %p48_p1, %p47_p0  ;;  %p127_p6 = scmp.eq.s32.totalorder %s903_s20, 1 }
   0xe   : > { %s1656_s22 = scalar_select %p1272_p3, 1, 0 }
   0xf   : > { %p1282_p7 = por %p1272_p3, %p53_p2  ;;  %p1286_p8 = por %p121_p4, %p47_p0 }
  0x10   : > { %p1290_p9 = por %p127_p6, %p53_p2  ;;  %p904_p10 = scmp.ge.s32.totalorder %s1198_s19, 1 }
  0x11   : > { %s1658_s24 = scalar_select %p1282_p7, 1, 0 }
  0x12   : > { %s1659_s25 = scalar_select %p1286_p8, 1, 0 }
  0x13   : > { %s1660_s26 = scalar_select %p1290_p9, 1, 0 }
  0x14   : > { %p134_p11 = scmp.lt.s32.totalorder %s1198_s19, 3  ;;  %s147_s29 = sshll.u32 %s1649_s1, 4  ;;  %s148_s29 = int_to_ptr.vmem [resolvable:$true] %s147_s29 }
  0x15   : > { %p999_p0 = scmp.lt.s32.totalorder %s1198_s19, 2  ;;  %s33_s6 = sadd.s32 1, %s1194_s18 }
  0x16   : > { %p1299_p12 = pnand %p904_p10, %p134_p11  ;;  %p1320_p6 = scmp.ge.s32.totalorder %s33_s6, 2 }
  0x17   : > { %p1309_p2 = pnand %p999_p0, %p1276_p5  ;;  %s161_s8 = sand.u32 1, %s1186_s16  }
  0x18   : > { %p986_p1 = pneg %p1299_p12  ;;  %s1067_s9 = scalar_lea.vmem %s148_s29, 16 }
  0x19   : > { %p1068_p10 = scmp.ne.s32.totalorder %s148_s29, %s1067_s9  ;;  %p1075_p13 = scmp.lt.s32.totalorder %s148_s29, %s148_s29 }
  0x1a   : > { %p1315_p4 = pnand %p986_p1, %p1272_p3  ;;  %p1076_p9 = scmp.lt.s32.totalorder %s1067_s9, %s1067_s9 }
  0x1c   : > { %p1069_p11 = pneg %p1315_p4  ;;  %p1077_p8 = por %p1076_p9, %p1075_p13 }
  0x1e   : > { %p1070_p5 = pnand %p1069_p11, %p1068_p10 }
  0x20   : > { %p1071_p0 = pneg %p1070_p5 }
  0x22   : > { %p1078_p1 = pnand %p1077_p8, %p1071_p0 }
  0x24   : > { %1081 = shalt.err (!%p1078_p1)
}
  0x25   : > { %s1200_s10 = smov [#allocation8]   ;;  %s1676_s6 = smov (%p1320_p6, %s33_s6), 0 }
  0x26   : > { %989 = dma.vmem_to_smem (!%p1315_p4), %s148_s29, 16, %s1200_s10, [#allocation7]  }
  0x27   : > { %s907_s11 = sshll.u32 %s161_s8, 6  ;;  %s37_s12 = ssub.s32 %s1194_s18, %s1676_s6 }
  0x28   : > { %p38_p9 = scmp.eq.s32.totalorder %s37_s12, 0  ;;  %s976_s13 = sshll.u32 %s1194_s18, 10 }
  0x29   : > { %s1339_s23 = scalar_lea.hbm %s1648_s0, %s976_s13  ;;  %s165_s27 = scalar_lea.vmem [#allocation4], %s907_s11 }
  0x2a   : > { %s172_s28 = sshll.u32 %s165_s27, 4  ;;  %s1348_s5 = scalar_lea.sflag [#allocation5], %s161_s8  ;;  %s1346_s28 = int_to_ptr.vmem [resolvable:$true] %s172_s28 }
  0x2b   : > { %s1344_s29 = scalar_select %p38_p9, %s1186_s16, %s40_s21  }
  0x2c   : > { %s1082_s7 = scalar_lea.hbm %s1339_s23, 1024  ;;  %p1084_p13 = pneg %p1309_p2 }
  0x2d   : > { %p1083_p8 = scmp.ne.s32.totalorder %s1339_s23, %s1082_s7  ;;  %s1087_s11 = scalar_lea.hbm %s1648_s0, 2048 }
  0x2e   : > { %p1088_p10 = scmp.lt.u32.totalorder %s1339_s23, %s1648_s0  ;;  %p1089_p11 = scmp.lt.u32.totalorder %s1087_s11, %s1082_s7 }
  0x2f   : > { %p1085_p4 = pnand %p1084_p13, %p1083_p8  ;;  %p1091_p0 = scmp.lt.u32.totalorder %s1082_s7, %s1339_s23 }
  0x30   : > { %p1090_p5 = por %p1089_p11, %p1088_p10 }
  0x31   : > { %p1086_p6 = pneg %p1085_p4 }
  0x32   : > { %p1092_p1 = por %p1091_p0, %p1090_p5 }
  0x34   : > { %p1093_p9 = pnand %p1092_p1, %p1086_p6 }
  0x36   : > { %1096 = shalt.err (!%p1093_p9)
}
  0x37   : > { %s1097_s21 = scalar_lea.vmem %s1346_s28, 1024  ;;  %s1201_s8 = smov [#allocation4]  }
  0x38   : > { %p1098_p8 = scmp.ne.s32.totalorder %s1346_s28, %s1097_s21  ;;  %s1102_s2 = sshll.u32 %s1201_s8, 4  ;;  %s1103_s2 = int_to_ptr.vmem [resolvable:$false] %s1102_s2 }
  0x39   : > { %s1104_s20 = scalar_lea.vmem %s1103_s2, 2048  ;;  %p1105_p7 = scmp.lt.s32.totalorder %s1346_s28, %s1103_s2 }
  0x3a   : > { %p1100_p4 = pnand %p1098_p8, %p1084_p13  ;;  %p1106_p10 = scmp.lt.s32.totalorder %s1104_s20, %s1097_s21 }
  0x3c   : > { %p1101_p3 = pneg %p1100_p4  ;;  %p1107_p11 = por %p1106_p10, %p1105_p7 }
  0x3e   : > { %p1108_p5 = pnand %p1107_p11, %p1101_p3 }
  0x40   : > { %1111 = shalt.err (!%p1108_p5)
}
  0x41   : > { %s1202_s27 = smov 128   ;;  %s1203_s7 = smov 8  }
  0x42   : > { %993 = dma.hbm_to_vmem [thread:$0]  (!%p1309_p2), %s1339_s23, 1024, %s1346_s28, %s1348_s5, %s1202_s27, %s1202_s27, %s1203_s7  }
  0x43   : > { %184 = sbr.rel (%p1299_p12) target bundleno = 468 (0x1d4), region = 32  ;;  %s1379_s9 = sand.u32 (!%p1299_p12), 1, %s1182_s15  }
  0x44   : > { %s911_s10 = sshll.u32 (!%p1299_p12), %s1379_s9, 6  ;;  %s187_s11 = scalar_lea.sflag (!%p1299_p12), [#allocation5], %s1379_s9 }
  0x45   : > { %s1383_s12 = scalar_lea.vmem (!%p1299_p12), [#allocation4], %s911_s10  ;;  %p1665_p3 = scmp.ne.s32.totalorder (!%p1299_p12), %s1658_s24, 0 }
  0x4a   : > { %1165 = dma.done.wait (%p1665_p3), %s187_s11, 1024  }
  0x4b   : > { %1167 = vsyncadd (%p1665_p3), %s187_s11, 4294966272  ;;  %p1666_p7 = scmp.ne.s32.totalorder %s1656_s22, 0 }
  0x4d   : > { %1169 = dma.done.wait (%p1666_p7), [#allocation7], 16  }
  0x4e   : > { %1171 = vsyncadd (%p1666_p7), [#allocation7], 4294967280 }
  0x4f   : > { %199 = sfence }
  0x50   : > { %v234_v0 = vld [vmem:[%s1383_s12] sm:$0xff]  ;;  %v236_v1 = vld [vmem:[%s1383_s12 + $0x10] sm:$0xff]  ;;  %vm220_vm0 = vcmask 146432   ;;  %s1204_s30 = smov 1   ;;  %vm223_vm1 = vcmask 140288   ;;  %v235_v2 = vld [vmem:[%s1383_s12 + $0x8] sm:$0xff] }
  0x51   : > { %250 = vrot.lane.b32.xlu0 %v234_v0, %s1204_s30  ;;  %254 = vrot.lane.b32.xlu1 %v236_v1, %s1204_s30  ;;  %v237_v3 = vld [vmem:[%s1383_s12 + $0x18] sm:$0xff]  ;;  %v1205_v4 = vmov 0.0   ;;  %v238_v5 = vld [vmem:[%s1383_s12 + $0x20] sm:$0xff]  ;;  %vm274_vm2 = vcmask 138248   ;;  %s914_s22 = sld [smem:[#allocation8 + $0x1]]  ;;  %s1403_s24 = sld [smem:[#allocation8 + $0x4]] }
  0x52   : > { %221 = vst.msk [vmem:[#allocation2] sm:$0xff] %vm220_vm0, %v1205_v4  ;;  %222 = vst.msk [vmem:[#allocation2 + $0x8] sm:$0xff] %vm220_vm0, %v1205_v4  ;;  %v239_v6 = vld [vmem:[%s1383_s12 + $0x28] sm:$0xff]  ;;  %v240_v7 = vld [vmem:[%s1383_s12 + $0x30] sm:$0xff]  ;;  %s1407_s4 = sld [smem:[#allocation8 + $0x7]]  ;;  %s1417_s23 = sld [smem:[#allocation8 + $0x2]] }
  0x53   : > { %225 = vst.msk [vmem:[#allocation2 + $0x18] sm:$0xff] %vm220_vm0, %v1205_v4  ;;  %226 = vst.msk [vmem:[#allocation2 + $0x20] sm:$0xff] %vm220_vm0, %v1205_v4  ;;  %v241_v8 = vld [vmem:[%s1383_s12 + $0x38] sm:$0xff]  ;;  %s1206_s28 = smov 127   ;;  %s935_s5 = sld [smem:[#allocation8 + $0x5]]  ;;  %vm752_vm3 = vcmask 130048  }
  0x54   : > { %228 = vst.msk [vmem:[#allocation2 + $0x30] sm:$0xff] %vm220_vm0, %v1205_v4  ;;  %229 = vst.msk [vmem:[#allocation2 + $0x38] sm:$0xff] %vm220_vm0, %v1205_v4  ;;  %s955_s13 = sld [smem:[#allocation8 + $0x8]]  ;;  %s919_s21 = sld [smem:[#allocation8 + $0xa]] }
  0x55   : > { %231 = vst.msk [vmem:[#allocation2 + $0x48] sm:$0xff] %vm220_vm0, %v1205_v4  ;;  %232 = vst.msk [vmem:[#allocation2 + $0x50] sm:$0xff] %vm220_vm0, %v1205_v4  ;;  %252 = vrot.lane.b32.xlu0 %v235_v2, %s1204_s30  ;;  %256 = vrot.lane.b32.xlu1 %v237_v3, %s1204_s30  ;;  %s1207_s8 = smov 126   ;;  %s939_s2 = sld [smem:[#allocation8 + $0xd]] }
  0x56   : > { %224 = vst.msk [vmem:[#allocation2 + $0x10] sm:$0x3] %vm223_vm1, %v1205_v4  ;;  %227 = vst.msk [vmem:[#allocation2 + $0x28] sm:$0x3] %vm223_vm1, %v1205_v4  ;;  %s959_s20 = sld [smem:[#allocation8 + $0x10]]  ;;  %s920_s27 = sld [smem:[#allocation8 + $0xb]] }
  0x57   : > { %230 = vst.msk [vmem:[#allocation2 + $0x40] sm:$0x3] %vm223_vm1, %v1205_v4  ;;  %233 = vst.msk [vmem:[#allocation2 + $0x58] sm:$0x3] %vm223_vm1, %v1205_v4  ;;  %v291_v13 = vstv %s914_s22  ;;  %v441_v19 = vstv %s1403_s24  ;;  %s940_s7 = sld [smem:[#allocation8 + $0xe]]  ;;  %s960_s10 = sld [smem:[#allocation8 + $0x11]] }
  0x58   : > { %v591_v27 = vstv %s1407_s4  ;;  %v305_v31 = vstv %s1417_s23  ;;  %s924_s11 = sld [smem:[#allocation8 + $0x13]]  ;;  %s944_s12 = sld [smem:[#allocation8 + $0x16]] }
  0x59   : > { %258 = vrot.lane.b32.xlu0 %v238_v5, %s1204_s30  ;;  %260 = vrot.lane.b32.xlu1 %v239_v6, %s1204_s30  ;;  %v455_v34 = vstv %s935_s5  ;;  %s925_s22 = sld [smem:[#allocation8 + $0x14]]  ;;  %s945_s24 = sld [smem:[#allocation8 + $0x17]] }
  0x5a   : > { %v605_v37 = vstv %s955_s13  ;;  %v329_v39 = vstv %s919_s21  ;;  %s965_s4 = sld [smem:[#allocation8 + $0x1a]]  ;;  %s929_s23 = sld [smem:[#allocation8 + $0x1c]] }
  0x5b   : > { %v479_v46 = vstv %s939_s2  ;;  %s949_s5 = sld [smem:[#allocation8 + $0x1f]]  ;;  %s969_s13 = sld [smem:[#allocation8 + $0x22]] }
  0x5c   : > { %v629_v51 = vstv %s959_s20  ;;  %v343_v55 = vstv %s920_s27  ;;  %s930_s21 = sld [smem:[#allocation8 + $0x1d]]  ;;  %s950_s2 = sld [smem:[#allocation8 + $0x20]] }
  0x5d   : > { %262 = vrot.lane.b32.xlu0 %v240_v7, %s1204_s30  ;;  %264 = vrot.lane.b32.xlu1 %v241_v8, %s1204_s30  ;;  %v493_v58 = vstv %s940_s7  ;;  %v643_v61 = vstv %s960_s10  ;;  %s964_s30 = sld [smem:[#allocation8 + $0x19]]  ;;  %s970_s20 = sld [smem:[#allocation8 + $0x23]] }
  0x5e   : > { %v367_v63 = vstv %s924_s11  ;;  %v517_v5 = vstv %s944_s12  ;;  %s931_s27 = sld [smem:[#allocation8 + $0x3]]  ;;  %s951_s7 = sld [smem:[#allocation8 + $0x6]] }
  0x5f   : > { %s916_s10 = sld [smem:[#allocation8 + $0x9]]  ;;  %s956_s11 = sld [smem:[#allocation8 + $0xf]] }
  0x60   : > { %s921_s12 = sld [smem:[#allocation8 + $0x12]]  ;;  %p1667_p2 = scmp.ne.s32.totalorder %s1659_s25, 0 }
  0xc3   : > { %v251_v9 = vpop.permute.xlu0 %250  ;;  %v255_v10 = vpop.permute.xlu1 %254 }
  0xc4   : > { %275 = vst.msk [vmem:[#allocation2 + $0x1] sm:$0xff] %vm274_vm2, %v251_v9  ;;  %277 = vst.msk [vmem:[#allocation2 + $0x19] sm:$0xff] %vm274_vm2, %v255_v10 }
  0xc7   : > { %v253_v11 = vpop.permute.xlu0 %252  ;;  %v257_v12 = vpop.permute.xlu1 %256 }
  0xc8   : > { %276 = vst.msk [vmem:[#allocation2 + $0x9] sm:$0xff] %vm274_vm2, %v253_v11  ;;  %278 = vst.msk [vmem:[#allocation2 + $0x21] sm:$0xff] %vm274_vm2, %v257_v12  ;;  %v667_v11 = vstv %s964_s30  ;;  %s941_s30 = sld [smem:[#allocation8 + $0x15]] }
  0xcb   : > { %v1409_v14 = vld [vmem:[#allocation2] sm:$0xff]  ;;  %v259_v15 = vpop.permute.xlu0 %258  ;;  %v261_v16 = vpop.permute.xlu1 %260  ;;  %v1448_v38 = vld [vmem:[#allocation2 + $0x18] sm:$0xff] }
  0xcc   : > { %v292_v17 = vmul.f32 %v291_v13, %v1409_v14  ;;  %279 = vst.msk [vmem:[#allocation2 + $0x31] sm:$0xff] %vm274_vm2, %v259_v15  ;;  %280 = vst.msk [vmem:[#allocation2 + $0x39] sm:$0xff] %vm274_vm2, %v261_v16  ;;  %v1414_v18 = vld [vmem:[#allocation2 + $0x1] sm:$0xff]  ;;  %v306_v33 = vmul.f32 %v305_v31, %v1409_v14  ;;  %v330_v42 = vmul.f32 %v1448_v38, %v329_v39  ;;  %v1458_v45 = vld [vmem:[#allocation2 + $0x19] sm:$0xff]  ;;  %v381_v16 = vstv %s925_s22  ;;  %s1574_s22 = sld [smem:[#allocation8 + $0x18]] }
  0xcd   : > { %v442_v24 = vmul.f32 %v1414_v18, %v441_v19  ;;  %v456_v36 = vmul.f32 %v1414_v18, %v455_v34  ;;  %v480_v48 = vmul.f32 %v1458_v45, %v479_v46  ;;  %v344_v57 = vmul.f32 %v1448_v38, %v343_v55 }
  0xce   : > { %296 = vrot.lane.b32.xlu0 %v292_v17, %s1206_s28  ;;  %v494_v60 = vmul.f32 %v1458_v45, %v493_v58 }
  0xcf   : > { %v1420_v20 = vld [vmem:[#allocation2 + $0x8] sm:$0xff]  ;;  %v263_v21 = vpop.permute.xlu0 %262  ;;  %v265_v22 = vpop.permute.xlu1 %264  ;;  %v1456_v44 = vld [vmem:[#allocation2 + $0x20] sm:$0xff] }
  0xd0   : > { %v293_v23 = vmul.f32 %v291_v13, %v1420_v20  ;;  %281 = vst.msk [vmem:[#allocation2 + $0x49] sm:$0xff] %vm274_vm2, %v263_v21  ;;  %282 = vst.msk [vmem:[#allocation2 + $0x51] sm:$0xff] %vm274_vm2, %v265_v22  ;;  %v1426_v25 = vld [vmem:[#allocation2 + $0x9] sm:$0xff]  ;;  %v307_v35 = vmul.f32 %v305_v31, %v1420_v20  ;;  %v331_v47 = vmul.f32 %v1456_v44, %v329_v39  ;;  %v1464_v49 = vld [vmem:[#allocation2 + $0x21] sm:$0xff]  ;;  %v531_v21 = vstv %s945_s24  ;;  %s926_s24 = sld [smem:[#allocation8 + $0x1b]] }
  0xd1   : > { %v1428_v26 = vld [vmem:[#allocation2 + $0x2] sm:$0xff]  ;;  %v443_v28 = vmul.f32 %v1426_v25, %v441_v19  ;;  %v1435_v30 = vld [vmem:[#allocation2 + $0xa] sm:$0xff]  ;;  %v457_v40 = vmul.f32 %v1426_v25, %v455_v34  ;;  %v1466_v50 = vld [vmem:[#allocation2 + $0x1a] sm:$0xff]  ;;  %v481_v52 = vmul.f32 %v1464_v49, %v479_v46  ;;  %v345_v59 = vmul.f32 %v1456_v44, %v343_v55 }
  0xd2   : > { %298 = vrot.lane.b32.xlu1 %v293_v23, %s1206_s28  ;;  %446 = vrot.lane.b32.xlu0 %v442_v24, %s1206_s28  ;;  %v592_v29 = vmul.f32 %v1428_v26, %v591_v27  ;;  %v593_v32 = vmul.f32 %v1435_v30, %v591_v27  ;;  %v606_v41 = vmul.f32 %v1428_v26, %v605_v37  ;;  %v1472_v54 = vld [vmem:[#allocation2 + $0x22] sm:$0xff]  ;;  %v681_v24 = vstv %s965_s4  ;;  %s946_s4 = sld [smem:[#allocation8 + $0x1e]] }
  0xd3   : > { %v607_v43 = vmul.f32 %v1435_v30, %v605_v37  ;;  %v630_v53 = vmul.f32 %v1466_v50, %v629_v51  ;;  %v631_v56 = vmul.f32 %v1472_v54, %v629_v51  ;;  %v1484_v62 = vld [vmem:[#allocation2 + $0x30] sm:$0xff]  ;;  %v495_v0 = vmul.f32 %v1464_v49, %v493_v58  ;;  %v1491_v3 = vld [vmem:[#allocation2 + $0x38] sm:$0xff] }
  0xd4   : > { %v644_v1 = vmul.f32 %v1466_v50, %v643_v61  ;;  %v368_v2 = vmul.f32 %v1484_v62, %v367_v63  ;;  %v1493_v4 = vld [vmem:[#allocation2 + $0x31] sm:$0xff]  ;;  %v645_v6 = vmul.f32 %v1472_v54, %v643_v61  ;;  %v369_v7 = vmul.f32 %v1491_v3, %v367_v63  ;;  %v1500_v9 = vld [vmem:[#allocation2 + $0x39] sm:$0xff] }
  0xd5   : > { %v518_v8 = vmul.f32 %v1493_v4, %v517_v5  ;;  %v1502_v10 = vld [vmem:[#allocation2 + $0x32] sm:$0xff]  ;;  %v519_v12 = vmul.f32 %v1500_v9, %v517_v5  ;;  %v1508_v15 = vld [vmem:[#allocation2 + $0x3a] sm:$0xff]  ;;  %v382_v19 = vmul.f32 %v1484_v62, %v381_v16  ;;  %v383_v22 = vmul.f32 %v1491_v3, %v381_v16 }
  0xd6   : > { %448 = vrot.lane.b32.xlu1 %v443_v28, %s1206_s28  ;;  %596 = vrot.lane.b32.xlu0 %v592_v29, %s1206_s28  ;;  %v668_v13 = vmul.f32 %v1502_v10, %v667_v11  ;;  %v669_v17 = vmul.f32 %v1508_v15, %v667_v11  ;;  %v532_v23 = vmul.f32 %v1493_v4, %v531_v21  ;;  %v405_v28 = vstv %s929_s23  ;;  %s1583_s23 = sld [smem:[#allocation8 + $0x21]] }
  0xd7   : > { %v1520_v27 = vld [vmem:[#allocation2 + $0x48] sm:$0xff]  ;;  %v533_v29 = vmul.f32 %v1500_v9, %v531_v21  ;;  %v682_v31 = vmul.f32 %v1502_v10, %v681_v24  ;;  %v587_v11 = vstv %s951_s7 }
  0xd8   : > { %v1529_v34 = vld [vmem:[#allocation2 + $0x49] sm:$0xff] }
  0xda   : > { %598 = vrot.lane.b32.xlu1 %v593_v32, %s1206_s28  ;;  %310 = vrot.lane.b32.xlu0 %v306_v33, %s1207_s8  ;;  %v406_v32 = vmul.f32 %v1520_v27, %v405_v28  ;;  %v1527_v33 = vld [vmem:[#allocation2 + $0x50] sm:$0xff] }
  0xdb   : > { %v407_v37 = vmul.f32 %v1527_v33, %v405_v28 }
  0xde   : > { %312 = vrot.lane.b32.xlu1 %v307_v35, %s1207_s8  ;;  %460 = vrot.lane.b32.xlu0 %v456_v36, %s1207_s8  ;;  %v555_v35 = vstv %s949_s5  ;;  %v683_v36 = vmul.f32 %v1508_v15, %v681_v24  ;;  %s734_s5 = sld [smem:[#allocation3]] }
  0xdf   : > { %v556_v39 = vmul.f32 %v1529_v34, %v555_v35 }
  0xe2   : > { %462 = vrot.lane.b32.xlu1 %v457_v40, %s1207_s8  ;;  %610 = vrot.lane.b32.xlu0 %v606_v41, %s1207_s8  ;;  %v1536_v40 = vld [vmem:[#allocation2 + $0x51] sm:$0xff] }
  0xe3   : > { %v1538_v41 = vld [vmem:[#allocation2 + $0x4a] sm:$0xff] }
  0xe6   : > { %612 = vrot.lane.b32.xlu1 %v607_v43, %s1207_s8  ;;  %334 = vrot.lane.b32.xlu0 %v330_v42, %s1206_s28  ;;  %v705_v42 = vstv %s969_s13  ;;  %v557_v43 = vmul.f32 %v1536_v40, %v555_v35  ;;  %s913_s13 = sshll.u32 %s1379_s9, 4 }
  0xe7   : > { %v706_v46 = vmul.f32 %v1538_v41, %v705_v42 }
  0xea   : > { %336 = vrot.lane.b32.xlu1 %v331_v47, %s1206_s28  ;;  %484 = vrot.lane.b32.xlu0 %v480_v48, %s1206_s28  ;;  %v1544_v47 = vld [vmem:[#allocation2 + $0x52] sm:$0xff]  ;;  %v419_v48 = vstv %s930_s21  ;;  %s977_s21 = sshll.u32 %s1190_s17, 8  ;;  %s1208_s17 = smov [#allocation9]  }
  0xeb   : > { %v707_v51 = vmul.f32 %v1544_v47, %v705_v42  ;;  %v421_v55 = vmul.f32 %v1527_v33, %v419_v48  ;;  %s1597_s7 = scalar_lea.hbm %s1651_s3, %s977_s21 }
  0xee   : > { %486 = vrot.lane.b32.xlu1 %v481_v52, %s1206_s28  ;;  %634 = vrot.lane.b32.xlu0 %v630_v53, %s1206_s28  ;;  %v420_v52 = vmul.f32 %v1520_v27, %v419_v48  ;;  %v569_v53 = vstv %s950_s2  ;;  %s217_s2 = scalar_lea.vmem [#allocation9], %s913_s13 }
  0xef   : > { %v571_v58 = vmul.f32 %v1536_v40, %v569_v53 }
  0xf2   : > { %636 = vrot.lane.b32.xlu1 %v631_v56, %s1206_s28  ;;  %348 = vrot.lane.b32.xlu0 %v344_v57, %s1207_s8  ;;  %v570_v56 = vmul.f32 %v1529_v34, %v569_v53  ;;  %v719_v57 = vstv %s970_s20  ;;  %s771_s20 = sshll.u32 %s217_s2, 4  ;;  %s1599_s20 = int_to_ptr.vmem [resolvable:$true] %s771_s20 }
  0xf6   : > { %350 = vrot.lane.b32.xlu1 %v345_v59, %s1207_s8  ;;  %498 = vrot.lane.b32.xlu0 %v494_v60, %s1207_s8  ;;  %v720_v59 = vmul.f32 %v1538_v41, %v719_v57  ;;  %v721_v60 = vmul.f32 %v1544_v47, %v719_v57 }
  0xfa   : > { %500 = vrot.lane.b32.xlu1 %v495_v0, %s1207_s8  ;;  %648 = vrot.lane.b32.xlu0 %v644_v1, %s1207_s8  ;;  %v437_v1 = vstv %s931_s27 }
  0xfb   : > { %v439_v16 = vmul.f32 %v1426_v25, %v437_v1 }
  0xfe   : > { %650 = vrot.lane.b32.xlu1 %v645_v6, %s1207_s8  ;;  %372 = vrot.lane.b32.xlu0 %v368_v2, %s1206_s28  ;;  %v438_v6 = vmul.f32 %v1414_v18, %v437_v1 }
 0x102   : > { %374 = vrot.lane.b32.xlu1 %v369_v7, %s1206_s28  ;;  %522 = vrot.lane.b32.xlu0 %v518_v8, %s1206_s28 }
 0x106   : > { %524 = vrot.lane.b32.xlu1 %v519_v12, %s1206_s28  ;;  %672 = vrot.lane.b32.xlu0 %v668_v13, %s1206_s28 }
 0x10a   : > { %674 = vrot.lane.b32.xlu1 %v669_v17, %s1206_s28  ;;  %386 = vrot.lane.b32.xlu0 %v382_v19, %s1207_s8  ;;  %v588_v17 = vmul.f32 %v1428_v26, %v587_v11 }
 0x10e   : > { %388 = vrot.lane.b32.xlu1 %v383_v22, %s1207_s8  ;;  %536 = vrot.lane.b32.xlu0 %v532_v23, %s1207_s8  ;;  %v323_v23 = vstv %s916_s10  ;;  %s756_s10 = scalar_lea.sflag [#allocation6], %s1379_s9 }
 0x112   : > { %538 = vrot.lane.b32.xlu1 %v533_v29, %s1207_s8  ;;  %686 = vrot.lane.b32.xlu0 %v682_v31, %s1207_s8  ;;  %v324_v31 = vmul.f32 %v1448_v38, %v323_v23 }
 0x116   : > { %688 = vrot.lane.b32.xlu1 %v683_v36, %s1207_s8  ;;  %410 = vrot.lane.b32.xlu0 %v406_v32, %s1206_s28 }
 0x11a   : > { %412 = vrot.lane.b32.xlu1 %v407_v37, %s1206_s28  ;;  %560 = vrot.lane.b32.xlu0 %v556_v39, %s1206_s28  ;;  %v325_v39 = vmul.f32 %v1456_v44, %v323_v23 }
 0x11e   : > { %562 = vrot.lane.b32.xlu1 %v557_v43, %s1206_s28  ;;  %710 = vrot.lane.b32.xlu0 %v706_v46, %s1206_s28  ;;  %v623_v43 = vstv %s956_s11  ;;  %s1116_s11 = sshll.u32 %s1208_s17, 4  ;;  %s1117_s11 = int_to_ptr.vmem [resolvable:$false] %s1116_s11 }
 0x11f   : > { %v624_v38 = vmul.f32 %v1466_v50, %v623_v43  ;;  %v625_v44 = vmul.f32 %v1472_v54, %v623_v43  ;;  %p1119_p0 = scmp.lt.s32.totalorder %s1599_s20, %s1117_s11 }
 0x122   : > { %712 = vrot.lane.b32.xlu1 %v707_v51, %s1206_s28  ;;  %424 = vrot.lane.b32.xlu0 %v420_v52, %s1207_s8  ;;  %s283_s28 = sld [smem:[#allocation8]] }
 0x126   : > { %426 = vrot.lane.b32.xlu1 %v421_v55, %s1207_s8  ;;  %574 = vrot.lane.b32.xlu0 %v570_v56, %s1207_s8 }
 0x128   : > { %v287_v61 = vstv %s283_s28 }
 0x129   : > { %v288_v63 = vmul.f32 %v287_v61, %v1409_v14  ;;  %v289_v5 = vmul.f32 %v287_v61, %v1420_v20  ;;  %v589_v20 = vmul.f32 %v1435_v30, %v587_v11 }
 0x12a   : > { %576 = vrot.lane.b32.xlu1 %v571_v58, %s1207_s8  ;;  %724 = vrot.lane.b32.xlu0 %v720_v59, %s1207_s8 }
 0x12e   : > { %726 = vrot.lane.b32.xlu1 %v721_v60, %s1207_s8  ;;  %s936_s8 = sld [smem:[#allocation8 + $0xc]] }
 0x134   : > { %v473_v32 = vstv %s936_s8  ;;  %s1112_s8 = scalar_lea.vmem %s1599_s20, 256 }
 0x135   : > { %v474_v42 = vmul.f32 %v1458_v45, %v473_v32  ;;  %v475_v55 = vmul.f32 %v1464_v49, %v473_v32  ;;  %p1113_p12 = scmp.ne.s32.totalorder %s1599_s20, %s1112_s8 }
 0x137   : > { %p1114_p13 = pnand %p1113_p12, %p1667_p2 }
 0x139   : > { %p1115_p6 = pneg %p1114_p13 }
 0x140   : > { %v297_v0 = vpop.permute.xlu0 %296 }
 0x141   : > { %v302_v2 = vadd.f32 %v297_v0, %v288_v63 }
 0x144   : > { %v299_v7 = vpop.permute.xlu1 %298  ;;  %v447_v8 = vpop.permute.xlu0 %446 }
 0x145   : > { %v303_v12 = vadd.f32 %v299_v7, %v289_v5  ;;  %v452_v13 = vadd.f32 %v447_v8, %v438_v6  ;;  %v511_v8 = vstv %s941_s30 }
 0x146   : > { %v513_v32 = vmul.f32 %v1500_v9, %v511_v8 }
 0x148   : > { %v449_v19 = vpop.permute.xlu1 %448  ;;  %v597_v14 = vpop.permute.xlu0 %596 }
 0x149   : > { %v453_v21 = vadd.f32 %v449_v19, %v439_v16  ;;  %v602_v22 = vadd.f32 %v597_v14, %v588_v17 }
 0x14c   : > { %v599_v24 = vpop.permute.xlu1 %598  ;;  %v311_v18 = vpop.permute.xlu0 %310 }
 0x14d   : > { %v603_v28 = vadd.f32 %v599_v24, %v589_v20  ;;  %v316_v29 = vadd.f32 %v311_v18, %v302_v2  ;;  %v361_v2 = vstv %s921_s12  ;;  %s1118_s12 = scalar_lea.vmem %s1117_s11, 512 }
 0x14e   : > { %v362_v7 = vmul.f32 %v1484_v62, %v361_v2  ;;  %v363_v14 = vmul.f32 %v1491_v3, %v361_v2  ;;  %p1120_p1 = scmp.lt.s32.totalorder %s1118_s12, %s1112_s8 }
 0x14f   : > { %v326_v35 = vadd.f32 %v324_v31, %v316_v29 }
 0x150   : > { %v313_v36 = vpop.permute.xlu1 %312  ;;  %v461_v25 = vpop.permute.xlu0 %460  ;;  %p1121_p9 = por %p1120_p1, %p1119_p0 }
 0x151   : > { %v317_v37 = vadd.f32 %v313_v36, %v303_v12  ;;  %v466_v26 = vadd.f32 %v461_v25, %v452_v13 }
 0x152   : > { %p1122_p8 = pnand %p1121_p9, %p1115_p6 }
 0x153   : > { %v327_v46 = vadd.f32 %v325_v39, %v317_v37  ;;  %v476_v48 = vadd.f32 %v474_v42, %v466_v26 }
 0x154   : > { %v463_v30 = vpop.permute.xlu1 %462  ;;  %v611_v51 = vpop.permute.xlu0 %610 }
 0x155   : > { %v467_v52 = vadd.f32 %v463_v30, %v453_v21  ;;  %v616_v53 = vadd.f32 %v611_v51, %v602_v22  ;;  %v512_v21 = vmul.f32 %v1493_v4, %v511_v8  ;;  %v661_v22 = vstv %s1574_s22 }
 0x156   : > { %v663_v4 = vmul.f32 %v1508_v15, %v661_v22  ;;  %v399_v51 = vstv %s926_s24 }
 0x157   : > { %v477_v56 = vadd.f32 %v475_v55, %v467_v52  ;;  %v626_v57 = vadd.f32 %v624_v38, %v616_v53  ;;  %v400_v55 = vmul.f32 %v1520_v27, %v399_v51  ;;  %v549_v38 = vstv %s946_s4 }
 0x158   : > { %v613_v58 = vpop.permute.xlu1 %612  ;;  %v335_v59 = vpop.permute.xlu0 %334 }
 0x159   : > { %v617_v60 = vadd.f32 %v613_v58, %v603_v28  ;;  %v340_v49 = vadd.f32 %v335_v59, %v326_v35  ;;  %v662_v35 = vmul.f32 %v1502_v10, %v661_v22 }
 0x15b   : > { %v627_v45 = vadd.f32 %v625_v44, %v617_v60 }
 0x15c   : > { %v337_v61 = vpop.permute.xlu1 %336  ;;  %v485_v63 = vpop.permute.xlu0 %484 }
 0x15d   : > { %v341_v11 = vadd.f32 %v337_v61, %v327_v46  ;;  %v490_v54 = vadd.f32 %v485_v63, %v476_v48  ;;  %v550_v61 = vmul.f32 %v1529_v34, %v549_v38  ;;  %v699_v63 = vstv %s1583_s23 }
 0x15e   : > { %v700_v8 = vmul.f32 %v1538_v41, %v699_v63  ;;  %v701_v34 = vmul.f32 %v1544_v47, %v699_v63  ;;  %v735_v47 = vstv %s734_s5 }
 0x160   : > { %v487_v0 = vpop.permute.xlu1 %486  ;;  %v635_v1 = vpop.permute.xlu0 %634 }
 0x161   : > { %v491_v23 = vadd.f32 %v487_v0, %v477_v56  ;;  %v640_v20 = vadd.f32 %v635_v1, %v626_v57 }
 0x164   : > { %v637_v50 = vpop.permute.xlu1 %636  ;;  %v349_v5 = vpop.permute.xlu0 %348 }
 0x165   : > { %v354_v6 = vadd.f32 %v349_v5, %v340_v49  ;;  %v641_v36 = vadd.f32 %v637_v50, %v627_v45  ;;  %v401_v45 = vmul.f32 %v1527_v33, %v399_v51 }
 0x167   : > { %v364_v12 = vadd.f32 %v362_v7, %v354_v6  ;;  %v551_v7 = vmul.f32 %v1536_v40, %v549_v38 }
 0x168   : > { %v351_v13 = vpop.permute.xlu1 %350  ;;  %v499_v16 = vpop.permute.xlu0 %498 }
 0x169   : > { %v355_v17 = vadd.f32 %v351_v13, %v341_v11  ;;  %v504_v19 = vadd.f32 %v499_v16, %v490_v54 }
 0x16b   : > { %v365_v24 = vadd.f32 %v363_v14, %v355_v17  ;;  %v514_v18 = vadd.f32 %v512_v21, %v504_v19 }
 0x16c   : > { %v501_v28 = vpop.permute.xlu1 %500  ;;  %v649_v29 = vpop.permute.xlu0 %648 }
 0x16d   : > { %v505_v62 = vadd.f32 %v501_v28, %v491_v23  ;;  %v654_v31 = vadd.f32 %v649_v29, %v640_v20 }
 0x16f   : > { %v515_v25 = vadd.f32 %v513_v32, %v505_v62  ;;  %v664_v37 = vadd.f32 %v662_v35, %v654_v31 }
 0x170   : > { %v651_v26 = vpop.permute.xlu1 %650  ;;  %v373_v3 = vpop.permute.xlu0 %372 }
 0x171   : > { %v655_v39 = vadd.f32 %v651_v26, %v641_v36  ;;  %v378_v9 = vadd.f32 %v373_v3, %v364_v12 }
 0x173   : > { %v665_v42 = vadd.f32 %v663_v4, %v655_v39 }
 0x174   : > { %v375_v43 = vpop.permute.xlu1 %374  ;;  %v523_v46 = vpop.permute.xlu0 %522 }
 0x175   : > { %v379_v56 = vadd.f32 %v375_v43, %v365_v24  ;;  %v528_v15 = vadd.f32 %v523_v46, %v514_v18 }
 0x178   : > { %v525_v48 = vpop.permute.xlu1 %524  ;;  %v673_v30 = vpop.permute.xlu0 %672 }
 0x179   : > { %v529_v0 = vadd.f32 %v525_v48, %v515_v25  ;;  %v678_v1 = vadd.f32 %v673_v30, %v664_v37 }
 0x17c   : > { %v675_v10 = vpop.permute.xlu1 %674  ;;  %v387_v52 = vpop.permute.xlu0 %386 }
 0x17d   : > { %v392_v53 = vadd.f32 %v387_v52, %v378_v9  ;;  %v679_v11 = vadd.f32 %v675_v10, %v665_v42 }
 0x17f   : > { %v402_v57 = vadd.f32 %v400_v55, %v392_v53 }
 0x180   : > { %v389_v58 = vpop.permute.xlu1 %388  ;;  %v537_v59 = vpop.permute.xlu0 %536 }
 0x181   : > { %v393_v60 = vadd.f32 %v389_v58, %v379_v56  ;;  %v542_v44 = vadd.f32 %v537_v59, %v528_v15 }
 0x183   : > { %v403_v2 = vadd.f32 %v401_v45, %v393_v60  ;;  %v552_v49 = vadd.f32 %v550_v61, %v542_v44 }
 0x184   : > { %v539_v50 = vpop.permute.xlu1 %538  ;;  %v687_v5 = vpop.permute.xlu0 %686 }
 0x185   : > { %v543_v27 = vadd.f32 %v539_v50, %v529_v0  ;;  %v692_v6 = vadd.f32 %v687_v5, %v678_v1 }
 0x187   : > { %v553_v54 = vadd.f32 %v551_v7, %v543_v27  ;;  %v702_v12 = vadd.f32 %v700_v8, %v692_v6 }
 0x188   : > { %v689_v13 = vpop.permute.xlu1 %688  ;;  %v411_v33 = vpop.permute.xlu0 %410 }
 0x189   : > { %v693_v16 = vadd.f32 %v689_v13, %v679_v11  ;;  %v416_v24 = vadd.f32 %v411_v33, %v402_v57 }
 0x18b   : > { %v703_v17 = vadd.f32 %v701_v34, %v693_v16 }
 0x18c   : > { %v413_v19 = vpop.permute.xlu1 %412  ;;  %v561_v14 = vpop.permute.xlu0 %560 }
 0x18d   : > { %v566_v40 = vadd.f32 %v561_v14, %v552_v49  ;;  %v417_v62 = vadd.f32 %v413_v19, %v403_v2 }
 0x190   : > { %v563_v21 = vpop.permute.xlu1 %562  ;;  %v711_v22 = vpop.permute.xlu0 %710 }
 0x191   : > { %v567_v31 = vadd.f32 %v563_v21, %v553_v54  ;;  %v716_v32 = vadd.f32 %v711_v22, %v702_v12 }
 0x194   : > { %v713_v23 = vpop.permute.xlu1 %712  ;;  %v425_v20 = vpop.permute.xlu0 %424 }
 0x195   : > { %v430_v28 = vadd.f32 %v425_v20, %v416_v24  ;;  %v717_v39 = vadd.f32 %v713_v23, %v703_v17 }
 0x198   : > { %v427_v18 = vpop.permute.xlu1 %426  ;;  %v575_v41 = vpop.permute.xlu0 %574 }
 0x199   : > { %v580_v29 = vadd.f32 %v575_v41, %v566_v40  ;;  %v431_v37 = vadd.f32 %v427_v18, %v417_v62 }
 0x19b   : > { %v732_v35 = vadd.f32 %v580_v29, %v430_v28 }
 0x19c   : > { %v577_v36 = vpop.permute.xlu1 %576  ;;  %v725_v25 = vpop.permute.xlu0 %724 }
 0x19d   : > { %v581_v26 = vadd.f32 %v577_v36, %v567_v31  ;;  %v730_v3 = vadd.f32 %v725_v25, %v716_v32 }
 0x19f   : > { %v733_v4 = vadd.f32 %v581_v26, %v431_v37  ;;  %v736_v42 = vadd.f32 %v735_v47, %v730_v3 }
 0x1a0   : > { %v727_v43 = vpop.permute.xlu1 %726 }
 0x1a1   : > { %v738_v46 = vadd.f32 %v736_v42, %v732_v35  ;;  %v731_v48 = vadd.f32 %v727_v43, %v717_v39 }
 0x1a3   : > { %v740_v30 = vsub.f32 0.0, %v738_v46  ;;  %v737_v51 = vadd.f32 %v735_v47, %v731_v48 }
 0x1a5   : > { %v742_v9 = vmul.f32 1.442695, %v740_v30  ;;  %v739_v10 = vadd.f32 %v737_v51, %v733_v4 }
 0x1a7   : > { %1059 = vpow2.f32 %v742_v9  ;;  %v741_v52 = vsub.f32 0.0, %v739_v10 }
 0x1a9   : > { %v744_v53 = vmul.f32 1.442695, %v741_v52 }
 0x1ab   : > { %1061 = vpow2.f32 %v744_v53 }
 0x1b1   : > { %v1060_v55 = vpop.eup %1059 }
 0x1b2   : > { %v746_v38 = vadd.f32 1.0, %v1060_v55 }
 0x1b4   : > { %1063 = vrcp.f32 %v746_v38 }
 0x1b5   : > { %v1062_v56 = vpop.eup %1061 }
 0x1b6   : > { %v747_v15 = vadd.f32 1.0, %v1062_v56 }
 0x1b8   : > { %1065 = vrcp.f32 %v747_v15 }
 0x1be   : > { %v1064_v57 = vpop.eup %1063 }
 0x1bf   : > { %v750_v58 = vmul.f32 2.0, %v1064_v57 }
 0x1c1   : > { %753 = vst.msk [vmem:[%s217_s2] sm:$0xff] %vm752_vm3, %v750_v58 }
 0x1c2   : > { %v1066_v59 = vpop.eup %1065 }
 0x1c3   : > { %v751_v60 = vmul.f32 2.0, %v1066_v59 }
 0x1c5   : > { %754 = vst.msk [vmem:[%s217_s2 + $0x8] sm:$0xff] %vm752_vm3, %v751_v60 }
 0x1c6   : > { %1125 = shalt.err (!%p1122_p8)
}
 0x1c7   : > { %s1126_s30 = scalar_lea.hbm %s1597_s7, 256  ;;  %s1130_s4 = scalar_lea.hbm %s1651_s3, 512 }
 0x1c8   : > { %p1127_p4 = scmp.ne.s32.totalorder %s1597_s7, %s1126_s30  ;;  %p1131_p5 = scmp.lt.u32.totalorder %s1597_s7, %s1651_s3 }
 0x1c9   : > { %p1132_p3 = scmp.lt.u32.totalorder %s1130_s4, %s1126_s30  ;;  %p1134_p12 = scmp.lt.u32.totalorder %s1126_s30, %s1597_s7 }
 0x1ca   : > { %p1128_p10 = pnand %p1127_p4, %p1667_p2 }
 0x1cb   : > { %p1133_p7 = por %p1132_p3, %p1131_p5 }
 0x1cc   : > { %p1129_p11 = pneg %p1128_p10 }
 0x1cd   : > { %p1135_p13 = por %p1134_p12, %p1133_p7 }
 0x1cf   : > { %p1136_p6 = pnand %p1135_p13, %p1129_p11 }
 0x1d1   : > { %1139 = shalt.err (!%p1136_p6)
}
 0x1d2   : > { %s1209_s13 = smov 128   ;;  %s1210_s21 = smov 8  }
 0x1d3   : > { %984 = dma.vmem_to_hbm [thread:$0]  (%p1667_p2), %s1599_s20, 256, %s1597_s7, %s756_s10, %s1209_s13, %s1209_s13, %s1210_s21  }
 0x1d4 PF: > { %s786_s2 = sand.u32 1, %s1178_s14   ;;  %p1668_p0 = scmp.ne.s32.totalorder %s1660_s26, 0 }
 0x1d5   : > { %p1669_p1 = scmp.ge.s32.totalorder %s1198_s19, 2  ;;  %s787_s28 = scalar_lea.sflag [#allocation6], %s786_s2 }
 0x1d7   : > { %p995_p9 = pnand %p1669_p1, %p1668_p0 }
 0x1d9   : > { %1173 = dma.done.wait (!%p995_p9), %s787_s28, 256  }
 0x1da   : > { %1175 = vsyncadd (!%p995_p9), %s787_s28, 4294967040  ;;  %s21_s19 = sadd.s32 1, %s1198_s19   ;;  %s1670_s14 = smov %s1182_s15 }
 0x1db   : > { %p18_p8 = scmp.ge.s32.totalorder %s21_s19, 4   ;;  %s1671_s15 = smov %s1186_s16 }
 0x1dc   : > { %s1672_s16 = smov %s1344_s29  ;;  %s1673_s17 = smov %s1194_s18 }
 0x1dd   : > { %s1674_s18 = smov %s1676_s6  ;;  %20 = sbr.rel (!%p18_p8) target bundleno = 9 (0x9), region = 94 }
 0x1e4   :  { %792 = vsyncpa [#allocation5], 1 }
 0x1e5   :  { %794 = vsyncpa [#allocation5 + $0x1], 1 }
 0x1e6   :  { %795 = vsyncpa [#allocation6], 1 }
 0x1e7   :  { %797 = vsyncpa [#allocation6 + $0x1], 1 }
 0x1e8   :  { %798 = vsyncpa [#allocation7], 1 }
 0x1e9   :  { %800 = vsyncpa [#allocation7 + $0x1], 1 }

</bundles_post_ra>
